<compile_context>
chip_gen: v7x
topology: tpu7x:2x2x1
jax: 0.10.0
libtpu: 0.0.40
codegen_flags: <defaults>
</compile_context>

<pallas_src>
import numpy as np
import jax
import jax.numpy as jnp
from jax.experimental import pallas as pl
from jax.experimental.pallas import tpu as pltpu


def _round_up(x: int, m: int) -> int:
    return ((x + m - 1) // m) * m


def _make_sinusoidal_table(max_len: int, hidden_size: int) -> jnp.ndarray:
    """Exactly reproduces PositionalEmbedding._init_posi_embedding."""
    pos = np.arange(max_len, dtype=np.float64)[:, None]          # (max_len, 1)
    idx = np.arange(hidden_size, dtype=np.float64)[None, :]      # (1, hidden)
    angle = pos / np.power(10000.0, 2.0 * idx / float(hidden_size))
    even_mask = (np.arange(hidden_size)[None, :] % 2) == 0
    table = np.where(even_mask, np.sin(angle), np.cos(angle)).astype(np.float32)
    return jnp.asarray(table)


def _pos_embed_kernel(idx_ref, table_ref, out_ref):
    # idx_ref:   (bn//128, 128) int32 lane-dense index block (VMEM)
    # table_ref: (V, E_pad) full table, VMEM-resident across all grid steps
    # out_ref:   (bn, E_pad) output tile (partial last block is masked by Pallas)
    v = table_ref.shape[0]
    n_row_chunks, lanes = idx_ref.shape            # lanes == 128, both static
    table = table_ref[...]                         # (V, E_pad)

    # row_ids[j, m] = j : one row id per sublane, replicated across lanes.
    row_ids = jax.lax.broadcasted_iota(jnp.int32, (v, lanes), 0)

    for r in range(n_row_chunks):                  # static unroll (bn // 128 chunks)
        idx_row = jnp.clip(idx_ref[r, :], 0, v - 1)                 # (128,) lanes
        # Transposed one-hot: sublane broadcast of idx_row, no lane->sublane move.
        onehot_t = (row_ids == idx_row[None, :]).astype(table.dtype)  # (V, 128)
        chunk = jax.lax.dot_general(                                # (128, E_pad)
            onehot_t, table,
            (((0,), (0,)), ((), ())),
            preferred_element_type=jnp.float32,
        )
        out_ref[r * lanes:(r + 1) * lanes, :] = chunk.astype(out_ref.dtype)


def positional_embedding_lookup(indices, table, *, block_n: int = 2048):
    """Pallas positional-embedding lookup.

    indices: int array, any shape.
    table:   (max_len, embedding_size) float array (VMEM-resident fast path).
    returns: indices.shape + (embedding_size,), dtype == table.dtype
    """
    v, e = table.shape
    dtype = table.dtype
    itemsize = jnp.dtype(dtype).itemsize
    orig_shape = indices.shape

    # Lane-align the embedding dim (ragged last dims turn stores into masked
    # vst.msk).  No-op when E is already a multiple of 128.
    e_pad = _round_up(e, 128)
    if e_pad != e:
        table = jnp.pad(table, ((0, 0), (0, e_pad - e)))

    flat = indices.reshape(-1).astype(jnp.int32)
    n = flat.shape[0]

    # Lane-dense index layout: (rows, 128) int32.  Pad the *tiny* index vector
    # to a multiple of 128; garbage tail indices are harmless (clamped in the
    # kernel, and their output rows fall in the masked part of the last block).
    n_ru = _round_up(n, 128)
    if n_ru != n:
        flat = jnp.pad(flat, (0, n_ru - n))
    idx2d = flat.reshape(n_ru // 128, 128)

    # Block size: either one block covering everything, or a multiple of 1024
    # (so the index block's sublane dim is a multiple of 8), capped so the
    # double-buffered output tiles stay within ~8 MiB of VMEM.
    vmem_budget = 8 * 1024 * 1024
    bn_cap = max(1024, ((vmem_budget // (2 * e_pad * itemsize)) // 1024) * 1024)
    bn_max = min(max(1024, (block_n // 1024) * 1024), bn_cap)
    bn = n_ru if n_ru <= bn_max else bn_max
    n_blocks = pl.cdiv(n, bn)

    cost = pl.CostEstimate(
        flops=2 * n_blocks * bn * v * e_pad,             # one-hot matmul gather
        transcendentals=0,
        bytes_accessed=(n * e_pad * itemsize             # output write (exact n)
                        + v * e_pad * itemsize           # table read once
                        + n_ru * 4),                     # lane-dense index read
    )

    out = pl.pallas_call(
        _pos_embed_kernel,
        out_shape=jax.ShapeDtypeStruct((n, e_pad), dtype),
        grid_spec=pltpu.PrefetchScalarGridSpec(
            num_scalar_prefetch=0,
            grid=(n_blocks,),
            in_specs=[
                # Lane-dense index block for this grid step.
                pl.BlockSpec((bn // 128, 128), lambda i: (i, 0)),
                # Full table, same block every step -> DMA'd once, VMEM-resident.
                pl.BlockSpec((v, e_pad), lambda i: (0, 0)),
            ],
            out_specs=pl.BlockSpec((bn, e_pad), lambda i: (i, 0)),
        ),
        compiler_params=pltpu.CompilerParams(
            dimension_semantics=("parallel",),
        ),
        cost_estimate=cost,
    )(idx2d, table)

    out = out.reshape(orig_shape + (e_pad,))
    if e_pad != e:
        out = out[..., :e]
    return out


class PositionalEmbedding:
    """JAX/Pallas port of the PyTorch PositionalEmbedding module."""

    def __init__(self, max_len: int, embedding_size: int):
        # Frozen sinusoidal table, identical to nn.Embedding.from_pretrained(...)
        self.weight = _make_sinusoidal_table(max_len, embedding_size)

    def __call__(self, x):
        return positional_embedding_lookup(x, self.weight)


if __name__ == "__main__":
    key = jax.random.PRNGKey(0)

    max_len = 64          # position vocabulary
    embedding_size = 128  # lane-aligned embedding dim
    batch, seq = 2, 8

    module = PositionalEmbedding(max_len, embedding_size)

    x = jax.random.randint(key, (batch, seq), 0, max_len, dtype=jnp.int32)

    out = module(x)
    out = jax.block_until_ready(out)

    # Reference: plain JAX gather (same semantics as nn.Embedding forward).
    ref = module.weight[x]
    assert out.shape == (batch, seq, embedding_size), out.shape
    assert out.dtype == module.weight.dtype
    assert jnp.allclose(out, ref, atol=1e-6), "Pallas positional embedding mismatch"

    print("KERNEL_OK")
</pallas_src>

<mosaic_0001>
module attributes {stable_mosaic.version = 11 : i64} {
  func.func @_pos_embed_kernel(%arg0: i32, %arg1: memref<1x128xi32, #tpu.memory_space<vmem>>, %arg2: memref<64x128xf32, #tpu.memory_space<vmem>>, %arg3: memref<128x128xf32, #tpu.memory_space<vmem>>) attributes {dimension_semantics = [#tpu.dimension_semantics<parallel>], iteration_bounds = array<i64: 1>, scalar_prefetch = 0 : i64, scratch_operands = 0 : i64, tpu.core_type = #tpu.core_type<tc>, window_params = [{transform_indices = @transform_0, window_bounds = array<i64: 1, 128>}, {pipeline_mode = #tpu.pipeline_mode<synchronous>, transform_indices = @transform_1, window_bounds = array<i64: 64, 128>}, {transform_indices = @transform_2, window_bounds = array<i64: 128, 128>}]} {
    %c0 = arith.constant 0 : index
    %c0_0 = arith.constant 0 : index
    %0 = vector.load %arg2[%c0, %c0_0] : memref<64x128xf32, #tpu.memory_space<vmem>>, vector<64x128xf32>
    %1 = tpu.iota {dimensions = array<i32: 0>} : vector<64x128xi32>
    %c0_1 = arith.constant 0 : index
    %c0_2 = arith.constant 0 : index
    %2 = vector.load %arg1[%c0_1, %c0_2] : memref<1x128xi32, #tpu.memory_space<vmem>>, vector<1x128xi32>
    %3 = vector.shape_cast %2 : vector<1x128xi32> to vector<128xi32>
    %c0_i32 = arith.constant 0 : i32
    %c63_i32 = arith.constant 63 : i32
    %4 = vector.broadcast %c0_i32 : i32 to vector<128xi32>
    %5 = arith.maxsi %4, %3 : vector<128xi32>
    %6 = vector.broadcast %c63_i32 : i32 to vector<128xi32>
    %7 = arith.minsi %6, %5 : vector<128xi32>
    %8 = vector.shape_cast %7 : vector<128xi32> to vector<1x128xi32>
    %9 = vector.broadcast %8 : vector<1x128xi32> to vector<64x128xi32>
    %10 = arith.cmpi eq, %1, %9 : vector<64x128xi32>
    %11 = arith.extui %10 : vector<64x128xi1> to vector<64x128xi32>
    %12 = arith.sitofp %11 : vector<64x128xi32> to vector<64x128xf32>
    %cst = arith.constant dense<0.000000e+00> : vector<128x128xf32>
    %13 = tpu.matmul %12, %0, %cst {dimension_numbers = #tpu.dot_dimension_numbers<[0], [0], [1], [1], [0, 1, 1, 1], [], []>} : vector<64x128xf32>, vector<64x128xf32>, vector<128x128xf32> -> vector<128x128xf32>
    %c0_3 = arith.constant 0 : index
    %c0_4 = arith.constant 0 : index
    %14 = vector.load %arg3[%c0_3, %c0_4] : memref<128x128xf32, #tpu.memory_space<vmem>>, vector<128x128xf32>
    tpu.vector_store %arg3[%c0_3, %c0_4], %13 {strides = array<i32>} : memref<128x128xf32, #tpu.memory_space<vmem>>, vector<128x128xf32>,
    return
  }
  func.func @transform_0(%arg0: i32) -> (i32, i32) {
    %c0_i32 = arith.constant 0 : i32
    %c0_i32_0 = arith.constant 0 : i32
    return %arg0, %c0_i32 : i32, i32
  }
  func.func @transform_1(%arg0: i32) -> (i32, i32) {
    %c0_i32 = arith.constant 0 : i32
    %c0_i32_0 = arith.constant 0 : i32
    %c0_i32_1 = arith.constant 0 : i32
    return %c0_i32, %c0_i32_0 : i32, i32
  }
  func.func @transform_2(%arg0: i32) -> (i32, i32) {
    %c0_i32 = arith.constant 0 : i32
    %c0_i32_0 = arith.constant 0 : i32
    return %arg0, %c0_i32 : i32, i32
  }
}

</mosaic_0001>

<bundles_post_ra>
// kernel: tpu_custom_call.1
= control target key start
LH: loop header
LB: loop body
LE: loop exit
PB: predicated region body
PF: predicated region fallthrough
CT: control target
= control target key end

     0   :  { %7 = vsyncpa [#allocation3], 0  ;;  %s624_s0 = inlined_call_operand.hbm [shape: s32[1,128], index: 0, kind: input, shape index: {}]   ;;  %s625_s1 = inlined_call_operand.hbm [shape: f32[64,128], index: 1, kind: input, shape index: {}]   ;;  %s626_s2 = inlined_call_operand.hbm [shape: f32[16,128], index: 2, kind: output, shape index: {}]  }
   0x1   :  { %8 = vsyncpa [#allocation6], 0 }
   0x2   :  { %9 = vsyncpa [#allocation4], 0  ;;  %s538_s9 = smov [#allocation2]   ;;  %s539_s11 = smov [#allocation5]  }
   0x3   :  { %s16_s10 = sshll.u32 %s538_s9, 4  ;;  %s25_s12 = sshll.u32 %s539_s11, 4  ;;  %s17_s10 = int_to_ptr.vmem [resolvable:$true] %s16_s10  ;;  %s559_s12 = int_to_ptr.vmem [resolvable:$true] %s25_s12 }
   0x4   :  { %s466_s15 = scalar_lea.hbm %s624_s0, 16 }
   0x5   :  { %p467_p0 = scmp.ne.s32.totalorder %s624_s0, %s466_s15  ;;  %p470_p1 = scmp.lt.u32.totalorder %s466_s15, %s624_s0 }
   0x7   :  { %p472_p2 = pnand %p470_p1, %p467_p0 }
   0x9   :  { %475 = shalt.err (!%p472_p2)
}
   0xa   :  { %s476_s20 = scalar_lea.vmem %s17_s10, 16  ;;  %s480_s21 = scalar_lea.vmem %s17_s10, 32 }
   0xb   :  { %p477_p3 = scmp.ne.s32.totalorder %s17_s10, %s476_s20  ;;  %p481_p4 = scmp.lt.s32.totalorder %s17_s10, %s17_s10 }
   0xc   :  { %p482_p5 = scmp.lt.s32.totalorder %s480_s21, %s476_s20 }
   0xe   :  { %p483_p6 = por %p482_p5, %p481_p4 }
  0x10   :  { %p484_p7 = pnand %p483_p6, %p477_p3 }
  0x12   :  { %487 = shalt.err (!%p484_p7)
}
  0x13   :  { %19 = dma.hbm_to_vmem [thread:$0]  %s624_s0, 16, %s17_s10, [#allocation3]  }
  0x14   :  { %s488_s26 = scalar_lea.hbm %s625_s1, 1024 }
  0x15   :  { %p489_p8 = scmp.ne.s32.totalorder %s625_s1, %s488_s26  ;;  %p492_p9 = scmp.lt.u32.totalorder %s488_s26, %s625_s1 }
  0x17   :  { %p494_p10 = pnand %p492_p9, %p489_p8 }
  0x19   :  { %497 = shalt.err (!%p494_p10)
}
  0x1a   :  { %s498_s3 = scalar_lea.vmem %s559_s12, 1024  ;;  %p503_p12 = scmp.lt.s32.totalorder %s559_s12, %s559_s12 }
  0x1b   :  { %p499_p11 = scmp.ne.s32.totalorder %s559_s12, %s498_s3  ;;  %p504_p13 = scmp.lt.s32.totalorder %s498_s3, %s498_s3 }
  0x1d   :  { %p505_p0 = por %p504_p13, %p503_p12 }
  0x1f   :  { %p506_p1 = pnand %p505_p0, %p499_p11 }
  0x21   :  { %509 = shalt.err (!%p506_p1)
}
  0x22   :  { %s540_s0 = smov 128   ;;  %s541_s4 = smov 8  }
  0x23   :  { %31 = dma.hbm_to_vmem [thread:$0]  %s625_s1, 1024, %s559_s12, [#allocation6], %s540_s0, %s540_s0, %s541_s4  }
  0x24   :  { %532 = dma.done.wait [#allocation3], 16  }
  0x25   :  { %533 = vsyncadd [#allocation3], 4294967280 }
  0x26   :  { %534 = dma.done.wait [#allocation6], 1024  }
  0x27   :  { %535 = vsyncadd [#allocation6], 4294966272  ;;  %v46_v0 = vlaneseq  ;;  %v55_v2 = vld [vmem:[#allocation2] sm:$0x1]  ;;  %v38_v3 = vld [vmem:[#allocation5] sm:$0xff]  ;;  %v542_v18 = vmov 0.0  }
  0x28   :  { %v39_v4 = vld [vmem:[#allocation5 + $0x8] sm:$0xff]  ;;  %vm56_vm0 = vcmp.gt.s32.totalorder %v55_v2, 0  ;;  %v40_v7 = vld [vmem:[#allocation5 + $0x10] sm:$0xff]  ;;  %v41_v8 = vld [vmem:[#allocation5 + $0x18] sm:$0xff]  ;;  %vm120_vm10 = vcmask 523264  }
  0x29   :  { %v47_v1 = vshrl.u32 %v46_v0, 7  ;;  %v436_v6 = vpack.c.bf16 %v39_v4, %v38_v3  ;;  %v57_v9 = vsel %vm56_vm0, %v55_v2, 0  ;;  %v440_v10 = vpack.c.bf16 %v41_v8, %v40_v7  ;;  %v42_v12 = vld [vmem:[#allocation5 + $0x20] sm:$0xff]  ;;  %v43_v13 = vld [vmem:[#allocation5 + $0x28] sm:$0xff]  ;;  %v44_v20 = vld [vmem:[#allocation5 + $0x30] sm:$0xff] }
  0x2a   :  { %vm58_vm1 = vcmp.lt.s32.totalorder %v57_v9, 63  ;;  %v444_v16 = vpack.c.bf16 %v43_v13, %v42_v12  ;;  %v45_v21 = vld [vmem:[#allocation5 + $0x38] sm:$0xff] }
  0x2b   :  { %v62_v5 = vsub.s32 0, %v47_v1  ;;  %v48_v11 = vadd.s32 8, %v47_v1  ;;  %437 = vmatprep.subr.bf16.mxu0 %v436_v6  ;;  %452 = vmatprep.subr.bf16.mxu1 %v436_v6  ;;  %v59_v14 = vsel %vm58_vm1, %v57_v9, 63  ;;  %v49_v17 = vadd.s32 16, %v47_v1 }
  0x2c   :  { %439 = vmatpush3.bf16.msra.mxu0 %v436_v6  ;;  %456 = vmatpush3.bf16.msra.mxu1 %v436_v6  ;;  %v50_v23 = vadd.s32 24, %v47_v1  ;;  %v448_v24 = vpack.c.bf16 %v45_v21, %v44_v20  ;;  %v51_v26 = vadd.s32 32, %v47_v1  ;;  %v52_v28 = vadd.s32 40, %v47_v1 }
  0x2d   :  { %v63_v15 = vrot.slane %v59_v14, %v62_v5  ;;  %441 = vmatprep.subr.bf16.mxu0 %v440_v10  ;;  %453 = vmatprep.subr.bf16.mxu1 %v440_v10  ;;  %v53_v30 = vadd.s32 48, %v47_v1  ;;  %v54_v32 = vadd.s32 56, %v47_v1 }
  0x2f   :  { %vm64_vm2 = vcmp.eq.s32.totalorder %v47_v1, %v63_v15  ;;  %vm65_vm3 = vcmp.eq.s32.totalorder %v48_v11, %v63_v15  ;;  %vm66_vm4 = vcmp.eq.s32.totalorder %v49_v17, %v63_v15  ;;  %vm67_vm5 = vcmp.eq.s32.totalorder %v50_v23, %v63_v15 }
  0x30   :  { %v348_v19 = vsel %vm64_vm2, 1.0, %v542_v18  ;;  %443 = vmatpush3.bf16.msra.mxu0 %v440_v10  ;;  %457 = vmatpush3.bf16.msra.mxu1 %v440_v10  ;;  %v349_v22 = vsel %vm65_vm3, 1.0, %v542_v18  ;;  %v350_v25 = vsel %vm66_vm4, 1.0, %v542_v18  ;;  %v351_v27 = vsel %vm67_vm5, 1.0, %v542_v18 }
  0x31   :  { %88 = vxpose.xlu0.b32.start [1/8] (short) %v348_v19, 128  ;;  %445 = vmatprep.subr.bf16.mxu0 %v444_v16  ;;  %vm68_vm6 = vcmp.eq.s32.totalorder %v51_v26, %v63_v15  ;;  %vm69_vm7 = vcmp.eq.s32.totalorder %v52_v28, %v63_v15  ;;  %vm70_vm8 = vcmp.eq.s32.totalorder %v53_v30, %v63_v15 }
  0x32   :  { %454 = vmatprep.subr.bf16.mxu1 %v444_v16  ;;  %v352_v29 = vsel %vm68_vm6, 1.0, %v542_v18  ;;  %v353_v31 = vsel %vm69_vm7, 1.0, %v542_v18  ;;  %v354_v33 = vsel %vm70_vm8, 1.0, %v542_v18  ;;  %vm71_vm9 = vcmp.eq.s32.totalorder %v54_v32, %v63_v15 }
  0x33   :  { %v355_v34 = vsel %vm71_vm9, 1.0, %v542_v18 }
  0x34   :  { %447 = vmatpush3.bf16.msra.mxu0 %v444_v16  ;;  %458 = vmatpush3.bf16.msra.mxu1 %v444_v16 }
  0x35   :  { %89 = vxpose.xlu0.b32.cont [2/8] (short) %v349_v22, 128  ;;  %449 = vmatprep.subr.bf16.mxu0 %v448_v24 }
  0x36   :  { %455 = vmatprep.subr.bf16.mxu1 %v448_v24 }
  0x38   :  { %451 = vmatpush3.bf16.msra.mxu0 %v448_v24  ;;  %459 = vmatpush3.bf16.msra.mxu1 %v448_v24 }
  0x39   :  { %90 = vxpose.xlu0.b32.cont [3/8] (short) %v350_v25, 128 }
  0x3d   :  { %91 = vxpose.xlu0.b32.cont [4/8] (short) %v351_v27, 128 }
  0x41   :  { %92 = vxpose.xlu0.b32.cont [5/8] (short) %v352_v29, 128 }
  0x45   :  { %93 = vxpose.xlu0.b32.cont [6/8] (short) %v353_v31, 128 }
  0x49   :  { %94 = vxpose.xlu0.b32.cont [7/8] (short) %v354_v33, 128 }
  0x4d   :  { %95 = vxpose.xlu0.b32.end [8/8] (short) %v355_v34, 128 }
  0xb1   :  { %v104_v35 = vpop.trf.xlu0 }
  0xb2   :  { %412 = vmatprep.mubr.msk.f32.mxu0 %vm120_vm10, %v104_v35 }
  0xb5   :  { %v105_v36 = vpop.trf.xlu0 }
  0xb6   :  { %413 = vmatmul.mubr.msk.f32.vlgmr.msra.gmra.mrb[0].mxu0 %vm120_vm10, %v105_v36 }
  0xb9   :  { %v106_v37 = vpop.trf.xlu0 }
  0xba   :  { %415 = vmatprep.mubr.msk.f32.mxu0 %vm120_vm10, %v106_v37 }
  0xbd   :  { %v107_v38 = vpop.trf.xlu0 }
  0xbe   :  { %416 = vmatmul.mubr.msk.f32.gmra.mrb[2].mxu0 %vm120_vm10, %v107_v38 }
  0xc1   :  { %v108_v39 = vpop.trf.xlu0 }
  0xc2   :  { %418 = vmatprep.mubr.msk.f32.mxu0 %vm120_vm10, %v108_v39 }
  0xc5   :  { %v109_v40 = vpop.trf.xlu0 }
  0xc6   :  { %419 = vmatmul.mubr.msk.f32.gmra.mrb[4].mxu0 %vm120_vm10, %v109_v40 }
  0xc9   :  { %v110_v41 = vpop.trf.xlu0 }
  0xca   :  { %421 = vmatprep.mubr.msk.f32.mxu0 %vm120_vm10, %v110_v41 }
  0xcd   :  { %v111_v42 = vpop.trf.xlu0 }
  0xce   :  { %422 = vmatmul.mubr.msk.f32.gmra.mrb[6].mxu0 %vm120_vm10, %v111_v42 }
  0xd1   :  { %v112_v43 = vpop.trf.xlu0 }
  0xd2   :  { %424 = vmatprep.mubr.msk.f32.mxu1 %vm120_vm10, %v112_v43 }
  0xd5   :  { %v113_v44 = vpop.trf.xlu0 }
  0xd6   :  { %425 = vmatmul.mubr.msk.f32.vlgmr.msra.gmra.mrb[0].mxu1 %vm120_vm10, %v113_v44 }
  0xd9   :  { %v114_v45 = vpop.trf.xlu0 }
  0xda   :  { %427 = vmatprep.mubr.msk.f32.mxu1 %vm120_vm10, %v114_v45 }
  0xdd   :  { %v115_v46 = vpop.trf.xlu0 }
  0xde   :  { %428 = vmatmul.mubr.msk.f32.gmra.mrb[2].mxu1 %vm120_vm10, %v115_v46 }
  0xe1   :  { %v116_v47 = vpop.trf.xlu0 }
  0xe2   :  { %430 = vmatprep.mubr.msk.f32.mxu1 %vm120_vm10, %v116_v47 }
  0xe5   :  { %v117_v48 = vpop.trf.xlu0 }
  0xe6   :  { %431 = vmatmul.mubr.msk.f32.gmra.mrb[4].mxu1 %vm120_vm10, %v117_v48 }
  0xe9   :  { %v118_v49 = vpop.trf.xlu0 }
  0xea   :  { %433 = vmatprep.mubr.msk.f32.mxu1 %vm120_vm10, %v118_v49 }
  0xed   :  { %v119_v50 = vpop.trf.xlu0 }
  0xee   :  { %434 = vmatmul.mubr.msk.f32.gmra.mrb[6].mxu1 %vm120_vm10, %v119_v50 }
 0x189   :  { %v414_v51 = vpop.f32.mrb[0].mxu0 }
 0x18a   :  { %315 = vst [vmem:[#allocation7 + $0x8] sm:$0xff] %v414_v51  ;;  %v235_v52 = vpop.f32.mrb[1].mxu0 }
 0x18b   :  { %314 = vst [vmem:[#allocation7] sm:$0xff] %v235_v52 }
 0x191   :  { %v417_v53 = vpop.f32.mrb[2].mxu0 }
 0x192   :  { %317 = vst [vmem:[#allocation7 + $0x18] sm:$0xff] %v417_v53  ;;  %v245_v54 = vpop.f32.mrb[3].mxu0 }
 0x193   :  { %316 = vst [vmem:[#allocation7 + $0x10] sm:$0xff] %v245_v54 }
 0x199   :  { %v420_v55 = vpop.f32.mrb[4].mxu0 }
 0x19a   :  { %319 = vst [vmem:[#allocation7 + $0x28] sm:$0xff] %v420_v55  ;;  %v255_v56 = vpop.f32.mrb[5].mxu0 }
 0x19b   :  { %318 = vst [vmem:[#allocation7 + $0x20] sm:$0xff] %v255_v56 }
 0x1a1   :  { %v423_v57 = vpop.f32.mrb[6].mxu0 }
 0x1a2   :  { %321 = vst [vmem:[#allocation7 + $0x38] sm:$0xff] %v423_v57  ;;  %v265_v58 = vpop.f32.mrb[7].mxu0 }
 0x1a3   :  { %320 = vst [vmem:[#allocation7 + $0x30] sm:$0xff] %v265_v58 }
 0x1a9   :  { %v426_v59 = vpop.f32.mrb[0].mxu1 }
 0x1aa   :  { %323 = vst [vmem:[#allocation7 + $0x48] sm:$0xff] %v426_v59  ;;  %v275_v60 = vpop.f32.mrb[1].mxu1 }
 0x1ab   :  { %322 = vst [vmem:[#allocation7 + $0x40] sm:$0xff] %v275_v60 }
 0x1b1   :  { %v429_v61 = vpop.f32.mrb[2].mxu1 }
 0x1b2   :  { %325 = vst [vmem:[#allocation7 + $0x58] sm:$0xff] %v429_v61  ;;  %v285_v62 = vpop.f32.mrb[3].mxu1 }
 0x1b3   :  { %324 = vst [vmem:[#allocation7 + $0x50] sm:$0xff] %v285_v62 }
 0x1b9   :  { %v432_v63 = vpop.f32.mrb[4].mxu1 }
 0x1ba   :  { %327 = vst [vmem:[#allocation7 + $0x68] sm:$0xff] %v432_v63  ;;  %v295_v0 = vpop.f32.mrb[5].mxu1 }
 0x1bb   :  { %326 = vst [vmem:[#allocation7 + $0x60] sm:$0xff] %v295_v0 }
 0x1c1   :  { %v435_v1 = vpop.f32.mrb[6].mxu1 }
 0x1c2   :  { %329 = vst [vmem:[#allocation7 + $0x78] sm:$0xff] %v435_v1  ;;  %v305_v2 = vpop.f32.mrb[7].mxu1 }
 0x1c3   :  { %328 = vst [vmem:[#allocation7 + $0x70] sm:$0xff] %v305_v2 }
 0x1c4   :  { %334 = vsyncadd [#allocation4], 1792  ;;  %s543_s1 = smov [#allocation7]  }
 0x1c5   :  { %s335_s7 = sshll.u32 %s543_s1, 4  ;;  %s336_s7 = int_to_ptr.vmem [resolvable:$true] %s335_s7 }
 0x1c6   :  { %s510_s8 = scalar_lea.vmem %s336_s7, 256  ;;  %s514_s9 = scalar_lea.vmem %s336_s7, 2048 }
 0x1c7   :  { %p511_p2 = scmp.ne.s32.totalorder %s336_s7, %s510_s8  ;;  %p515_p3 = scmp.lt.s32.totalorder %s336_s7, %s336_s7 }
 0x1c8   :  { %p516_p4 = scmp.lt.s32.totalorder %s514_s9, %s510_s8 }
 0x1ca   :  { %p517_p5 = por %p516_p4, %p515_p3 }
 0x1cc   :  { %p518_p6 = pnand %p517_p5, %p511_p2 }
 0x1ce   :  { %521 = shalt.err (!%p518_p6)
}
 0x1cf   :  { %s522_s12 = scalar_lea.hbm %s626_s2, 256 }
 0x1d0   :  { %p523_p7 = scmp.ne.s32.totalorder %s626_s2, %s522_s12  ;;  %p526_p8 = scmp.lt.u32.totalorder %s522_s12, %s626_s2 }
 0x1d2   :  { %p528_p9 = pnand %p526_p8, %p523_p7 }
 0x1d4   :  { %531 = shalt.err (!%p528_p9)
}
 0x1d5   :  { %341 = dma.vmem_to_hbm [thread:$0]  %s336_s7, 256, %s626_s2, [#allocation4], %s540_s0, %s540_s0, %s541_s4  }
 0x1d6   :  { %536 = dma.done.wait [#allocation4], 2048  }
 0x1d7   :  { %537 = vsyncadd [#allocation4], 4294965248 }
 0x1d8   :  { %345 = vsyncpa [#allocation3], 1 }
 0x1d9   :  { %346 = vsyncpa [#allocation6], 1 }
 0x1da   :  { %347 = vsyncpa [#allocation4], 1 }

</bundles_post_ra>
